<compile_context>
chip_gen: v7x
topology: tpu7x:2x2x1
jax: 0.10.0
libtpu: 0.0.40
codegen_flags: <defaults>
</compile_context>

<pallas_src>
import functools

import jax
import jax.numpy as jnp
from jax import lax
from jax.experimental import pallas as pl
from jax.experimental.pallas import tpu as pltpu

LN_EPS = 1e-5   # PyTorch nn.LayerNorm default
LANE = 128      # TPU lane width
SUBLANE = 8     # f32 sublane packing


def _round_up(x, m):
    return (x + m - 1) // m * m


def _layernorm(h, gamma, beta, d_valid, mask):
    """LayerNorm over the last axis, restricted to the first d_valid lanes.

    Padded lanes of `h` are exactly zero by construction (zero-padded weights
    and biases), so the unmasked sum already equals the valid-lane sum; only
    the centered term needs masking for the variance.
    """
    inv_d = 1.0 / d_valid
    mu = jnp.sum(h, axis=-1, keepdims=True) * inv_d
    cen = h - mu
    if mask is not None:
        cen = jnp.where(mask, cen, 0.0)
    var = jnp.sum(cen * cen, axis=-1, keepdims=True) * inv_d
    return cen * lax.rsqrt(var + LN_EPS) * gamma + beta


def resblock_kernel(x_ref, w1_ref, b1_ref, g1_ref, be1_ref,
                    w2_ref, b2_ref, g2_ref, be2_ref, o_ref,
                    *, d_valid, d_pad):
    w_dtype = w1_ref.dtype

    # Static no-op when the feature dim is already lane-aligned.
    mask = None
    if d_valid != d_pad:
        mask = lax.broadcasted_iota(jnp.int32, (x_ref.shape[0], d_pad), 1) < d_valid

    # Linear 1 (MXU, operands in w_dtype, f32 accumulate) + LayerNorm 1 (f32)
    h = jnp.dot(x_ref[...].astype(w_dtype), w1_ref[...],
                preferred_element_type=jnp.float32) + b1_ref[...]
    h = _layernorm(h, g1_ref[...], be1_ref[...], d_valid, mask)

    # Linear 2 + LayerNorm 2
    h = jnp.dot(h.astype(w_dtype), w2_ref[...],
                preferred_element_type=jnp.float32) + b2_ref[...]
    h = _layernorm(h, g2_ref[...], be2_ref[...], d_valid, mask)

    # ReLU + residual. Re-read x_ref here instead of keeping the residual live
    # across both matmuls (lower vreg pressure at large batch tiles).
    o_ref[...] = x_ref[...] + jnp.maximum(h, 0.0)


def prepare_params(params, *, matmul_dtype=jnp.float32):
    """One-time parameter preprocessing (call once at load time, not per step).

    - transpose nn.Linear weights (out,in) -> (in,out)
    - zero-pad the feature dim to a multiple of 128 lanes
    - cast matmul weights to `matmul_dtype` (bf16 recommended for large D)
    - reshape 1-D params to (1, Dp) rows for lane-aligned broadcast
    """
    d = params["w1"].shape[0]
    dp = _round_up(d, LANE)

    def pad_w(w):
        wt = jnp.asarray(w).T
        return jnp.pad(wt, ((0, dp - d), (0, dp - d))).astype(matmul_dtype)

    def pad_v(v):
        return jnp.pad(jnp.asarray(v, jnp.float32), (0, dp - d)).reshape(1, dp)

    return {
        "d": d, "dp": dp,
        "w1": pad_w(params["w1"]), "w2": pad_w(params["w2"]),
        "b1": pad_v(params["b1"]), "b2": pad_v(params["b2"]),
        "g1": pad_v(params["g1"]), "be1": pad_v(params["be1"]),
        "g2": pad_v(params["g2"]), "be2": pad_v(params["be2"]),
    }


def resblock_forward(x, prep, *, block_b=None, single_buffer_weights=True):
    """x: (B, D) float32. prep: output of prepare_params()."""
    B, D = x.shape
    d, dp = prep["d"], prep["dp"]
    assert D == d

    if block_b is None:
        # Big enough to pipeline / amortize per-step overhead, small enough to
        # double-buffer alongside the resident weights in VMEM.
        block_b = min(512, _round_up(B, SUBLANE))
    block_b = _round_up(block_b, SUBLANE)
    bp = _round_up(B, block_b)

    x_pad = x
    if (bp, dp) != (B, D):
        x_pad = jnp.pad(x, ((0, bp - B), (0, dp - D)))

    grid = (bp // block_b,)

    x_spec = pl.BlockSpec((block_b, dp), lambda i: (i, 0))
    # Weights / vectors have a constant index_map -> single-buffer them so the
    # pipeline doesn't hold two copies of each (D,D) block (v7x: 64 MiB VMEM).
    const_mode = pl.Buffered(1) if single_buffer_weights else None
    w_spec = pl.BlockSpec((dp, dp), lambda i: (0, 0), pipeline_mode=const_mode)
    v_spec = pl.BlockSpec((1, dp), lambda i: (0, 0), pipeline_mode=const_mode)

    # VMEM budget: weights + vectors (x nbuf) + double-buffered x/out tiles.
    w_itemsize = jnp.dtype(prep["w1"].dtype).itemsize
    nbuf_w = 1 if single_buffer_weights else 2
    est = (2 * dp * dp * w_itemsize * nbuf_w
           + 6 * dp * 4 * nbuf_w
           + 2 * 2 * block_b * dp * 4)
    vmem_limit = int(min(96 * 2**20, max(32 * 2**20, 2 * est)))
    # TODO(synk): for D large enough that single-buffered weights still exceed
    # the per-generation VMEM budget (~1.4k f32 on v7x), add K/N weight tiling
    # with an f32 accumulator scratch (P3 pattern).

    kernel = functools.partial(resblock_kernel, d_valid=d, d_pad=dp)

    out = pl.pallas_call(
        kernel,
        out_shape=jax.ShapeDtypeStruct((bp, dp), x.dtype),
        grid_spec=pltpu.PrefetchScalarGridSpec(
            num_scalar_prefetch=0,
            grid=grid,
            in_specs=[x_spec,
                      w_spec, v_spec, v_spec, v_spec,
                      w_spec, v_spec, v_spec, v_spec],
            out_specs=x_spec,
        ),
        compiler_params=pltpu.CompilerParams(
            dimension_semantics=("parallel",),
            vmem_limit_bytes=vmem_limit),
    )(x_pad, prep["w1"], prep["b1"], prep["g1"], prep["be1"],
      prep["w2"], prep["b2"], prep["g2"], prep["be2"])

    if (bp, dp) != (B, D):
        out = out[:B, :D]
    return out


def init_params(key, dim):
    """Deterministic synthetic parameters with PyTorch nn.Linear/LayerNorm shapes."""
    k1, k2, k3, k4 = jax.random.split(key, 4)
    bound = 1.0 / jnp.sqrt(dim)
    return {
        # nn.Linear(dim, dim): weight (out, in), bias (out,)
        "w1": jax.random.uniform(k1, (dim, dim), jnp.float32, -bound, bound),
        "b1": jax.random.uniform(k2, (dim,), jnp.float32, -bound, bound),
        "w2": jax.random.uniform(k3, (dim, dim), jnp.float32, -bound, bound),
        "b2": jax.random.uniform(k4, (dim,), jnp.float32, -bound, bound),
        # nn.LayerNorm(dim): gamma=1, beta=0
        "g1": jnp.ones((dim,), jnp.float32),
        "be1": jnp.zeros((dim,), jnp.float32),
        "g2": jnp.ones((dim,), jnp.float32),
        "be2": jnp.zeros((dim,), jnp.float32),
    }


def resblock_ref(x, p):
    """Pure-JAX reference matching the PyTorch forward."""
    h = x @ p["w1"].T + p["b1"]
    mu = h.mean(-1, keepdims=True)
    var = ((h - mu) ** 2).mean(-1, keepdims=True)
    h = (h - mu) / jnp.sqrt(var + LN_EPS) * p["g1"] + p["be1"]
    h = h @ p["w2"].T + p["b2"]
    mu = h.mean(-1, keepdims=True)
    var = ((h - mu) ** 2).mean(-1, keepdims=True)
    h = (h - mu) / jnp.sqrt(var + LN_EPS) * p["g2"] + p["be2"]
    return x + jnp.maximum(h, 0.0)


def _run_forward(x, prep, **kw):
    try:
        return jax.block_until_ready(resblock_forward(x, prep, **kw))
    except Exception:
        # Graceful fallback if this jax version rejects pl.Buffered(1)
        # (single-buffered constant weight blocks) -- perf-only feature.
        return jax.block_until_ready(
            resblock_forward(x, prep, single_buffer_weights=False, **kw))


if __name__ == "__main__":
    key = jax.random.PRNGKey(0)
    kx, kp = jax.random.split(key)

    batch, dim = 8, 32
    x = jax.random.normal(kx, (batch, dim), jnp.float32)
    params = init_params(kp, dim)
    ref = resblock_ref(x, params)

    # f32 matmul path: must match the PyTorch-equivalent reference tightly.
    prep_f32 = prepare_params(params, matmul_dtype=jnp.float32)
    out = _run_forward(x, prep_f32)
    assert out.shape == (batch, dim)
    assert jnp.allclose(out, ref, atol=1e-5, rtol=1e-5)

    # bf16 matmul operands (perf option for large D): LN/bias/residual stay f32,
    # so only MXU-operand rounding differs -> loose tolerance smoke test.
    prep_bf16 = prepare_params(params, matmul_dtype=jnp.bfloat16)
    out_bf16 = _run_forward(x, prep_bf16)
    assert out_bf16.shape == (batch, dim)
    assert jnp.allclose(out_bf16, ref, atol=1e-1, rtol=1e-1)

    print("KERNEL_OK")
</pallas_src>

<mosaic_0001>
module attributes {stable_mosaic.version = 11 : i64} {
  func.func @resblock_kernel(%arg0: i32, %arg1: memref<8x128xf32, #tpu.memory_space<vmem>>, %arg2: memref<128x128xf32, #tpu.memory_space<vmem>>, %arg3: memref<1x128xf32, #tpu.memory_space<vmem>>, %arg4: memref<1x128xf32, #tpu.memory_space<vmem>>, %arg5: memref<1x128xf32, #tpu.memory_space<vmem>>, %arg6: memref<128x128xf32, #tpu.memory_space<vmem>>, %arg7: memref<1x128xf32, #tpu.memory_space<vmem>>, %arg8: memref<1x128xf32, #tpu.memory_space<vmem>>, %arg9: memref<1x128xf32, #tpu.memory_space<vmem>>, %arg10: memref<8x128xf32, #tpu.memory_space<vmem>>) attributes {dimension_semantics = [#tpu.dimension_semantics<parallel>], iteration_bounds = array<i64: 1>, scalar_prefetch = 0 : i64, scratch_operands = 0 : i64, tpu.core_type = #tpu.core_type<tc>, window_params = [{transform_indices = @transform_0, window_bounds = array<i64: 8, 128>}, {pipeline_mode = #tpu.pipeline_mode<synchronous>, transform_indices = @transform_1, window_bounds = array<i64: 128, 128>}, {pipeline_mode = #tpu.pipeline_mode<synchronous>, transform_indices = @transform_2, window_bounds = array<i64: 1, 128>}, {pipeline_mode = #tpu.pipeline_mode<synchronous>, transform_indices = @transform_3, window_bounds = array<i64: 1, 128>}, {pipeline_mode = #tpu.pipeline_mode<synchronous>, transform_indices = @transform_4, window_bounds = array<i64: 1, 128>}, {pipeline_mode = #tpu.pipeline_mode<synchronous>, transform_indices = @transform_5, window_bounds = array<i64: 128, 128>}, {pipeline_mode = #tpu.pipeline_mode<synchronous>, transform_indices = @transform_6, window_bounds = array<i64: 1, 128>}, {pipeline_mode = #tpu.pipeline_mode<synchronous>, transform_indices = @transform_7, window_bounds = array<i64: 1, 128>}, {pipeline_mode = #tpu.pipeline_mode<synchronous>, transform_indices = @transform_8, window_bounds = array<i64: 1, 128>}, {transform_indices = @transform_9, window_bounds = array<i64: 8, 128>}]} {
    %0 = tpu.iota {dimensions = array<i32: 1>} : vector<8x128xi32>
    %c32_i32 = arith.constant 32 : i32
    %1 = vector.broadcast %c32_i32 : i32 to vector<8x128xi32>
    %2 = arith.cmpi slt, %0, %1 : vector<8x128xi32>
    %c0 = arith.constant 0 : index
    %c0_0 = arith.constant 0 : index
    %3 = vector.load %arg1[%c0, %c0_0] : memref<8x128xf32, #tpu.memory_space<vmem>>, vector<8x128xf32>
    %c0_1 = arith.constant 0 : index
    %c0_2 = arith.constant 0 : index
    %4 = vector.load %arg2[%c0_1, %c0_2] : memref<128x128xf32, #tpu.memory_space<vmem>>, vector<128x128xf32>
    %cst = arith.constant dense<0.000000e+00> : vector<8x128xf32>
    %5 = tpu.matmul %3, %4, %cst {dimension_numbers = #tpu.dot_dimension_numbers<[1], [0], [0], [1], [0, 0, 1, 1], [], []>} : vector<8x128xf32>, vector<128x128xf32>, vector<8x128xf32> -> vector<8x128xf32>
    %c0_3 = arith.constant 0 : index
    %c0_4 = arith.constant 0 : index
    %6 = vector.load %arg3[%c0_3, %c0_4] : memref<1x128xf32, #tpu.memory_space<vmem>>, vector<1x128xf32>
    %7 = vector.broadcast %6 : vector<1x128xf32> to vector<8x128xf32>
    %8 = arith.addf %5, %7 : vector<8x128xf32>
    %c0_5 = arith.constant 0 : index
    %c0_6 = arith.constant 0 : index
    %9 = vector.load %arg4[%c0_5, %c0_6] : memref<1x128xf32, #tpu.memory_space<vmem>>, vector<1x128xf32>
    %c0_7 = arith.constant 0 : index
    %c0_8 = arith.constant 0 : index
    %10 = vector.load %arg5[%c0_7, %c0_8] : memref<1x128xf32, #tpu.memory_space<vmem>>, vector<1x128xf32>
    %cst_9 = arith.constant dense<0.000000e+00> : vector<8xf32>
    %11 = vector.multi_reduction <add>, %8, %cst_9 [1] : vector<8x128xf32> to vector<8xf32>
    %12 = vector.shape_cast %11 : vector<8xf32> to vector<8x1xf32>
    %cst_10 = arith.constant 3.125000e-02 : f32
    %13 = vector.broadcast %cst_10 : f32 to vector<8x1xf32>
    %14 = arith.mulf %12, %13 : vector<8x1xf32>
    %15 = vector.broadcast %14 : vector<8x1xf32> to vector<8x128xf32>
    %16 = arith.subf %8, %15 : vector<8x128xf32>
    %cst_11 = arith.constant 0.000000e+00 : f32
    %17 = vector.broadcast %cst_11 : f32 to vector<8x128xf32>
    %18 = arith.select %2, %16, %17 : vector<8x128xi1>, vector<8x128xf32>
    %19 = arith.mulf %18, %18 : vector<8x128xf32>
    %cst_12 = arith.constant dense<0.000000e+00> : vector<8xf32>
    %20 = vector.multi_reduction <add>, %19, %cst_12 [1] : vector<8x128xf32> to vector<8xf32>
    %21 = vector.shape_cast %20 : vector<8xf32> to vector<8x1xf32>
    %cst_13 = arith.constant 3.125000e-02 : f32
    %22 = vector.broadcast %cst_13 : f32 to vector<8x1xf32>
    %23 = arith.mulf %21, %22 : vector<8x1xf32>
    %cst_14 = arith.constant 9.99999974E-6 : f32
    %24 = vector.broadcast %cst_14 : f32 to vector<8x1xf32>
    %25 = arith.addf %23, %24 : vector<8x1xf32>
    %26 = math.rsqrt %25 : vector<8x1xf32>
    %27 = vector.broadcast %26 : vector<8x1xf32> to vector<8x128xf32>
    %28 = arith.mulf %18, %27 : vector<8x128xf32>
    %29 = vector.broadcast %9 : vector<1x128xf32> to vector<8x128xf32>
    %30 = arith.mulf %28, %29 : vector<8x128xf32>
    %31 = vector.broadcast %10 : vector<1x128xf32> to vector<8x128xf32>
    %32 = arith.addf %30, %31 : vector<8x128xf32>
    %c0_15 = arith.constant 0 : index
    %c0_16 = arith.constant 0 : index
    %33 = vector.load %arg6[%c0_15, %c0_16] : memref<128x128xf32, #tpu.memory_space<vmem>>, vector<128x128xf32>
    %cst_17 = arith.constant dense<0.000000e+00> : vector<8x128xf32>
    %34 = tpu.matmul %32, %33, %cst_17 {dimension_numbers = #tpu.dot_dimension_numbers<[1], [0], [0], [1], [0, 0, 1, 1], [], []>} : vector<8x128xf32>, vector<128x128xf32>, vector<8x128xf32> -> vector<8x128xf32>
    %c0_18 = arith.constant 0 : index
    %c0_19 = arith.constant 0 : index
    %35 = vector.load %arg7[%c0_18, %c0_19] : memref<1x128xf32, #tpu.memory_space<vmem>>, vector<1x128xf32>
    %36 = vector.broadcast %35 : vector<1x128xf32> to vector<8x128xf32>
    %37 = arith.addf %34, %36 : vector<8x128xf32>
    %c0_20 = arith.constant 0 : index
    %c0_21 = arith.constant 0 : index
    %38 = vector.load %arg8[%c0_20, %c0_21] : memref<1x128xf32, #tpu.memory_space<vmem>>, vector<1x128xf32>
    %c0_22 = arith.constant 0 : index
    %c0_23 = arith.constant 0 : index
    %39 = vector.load %arg9[%c0_22, %c0_23] : memref<1x128xf32, #tpu.memory_space<vmem>>, vector<1x128xf32>
    %cst_24 = arith.constant dense<0.000000e+00> : vector<8xf32>
    %40 = vector.multi_reduction <add>, %37, %cst_24 [1] : vector<8x128xf32> to vector<8xf32>
    %41 = vector.shape_cast %40 : vector<8xf32> to vector<8x1xf32>
    %cst_25 = arith.constant 3.125000e-02 : f32
    %42 = vector.broadcast %cst_25 : f32 to vector<8x1xf32>
    %43 = arith.mulf %41, %42 : vector<8x1xf32>
    %44 = vector.broadcast %43 : vector<8x1xf32> to vector<8x128xf32>
    %45 = arith.subf %37, %44 : vector<8x128xf32>
    %cst_26 = arith.constant 0.000000e+00 : f32
    %46 = vector.broadcast %cst_26 : f32 to vector<8x128xf32>
    %47 = arith.select %2, %45, %46 : vector<8x128xi1>, vector<8x128xf32>
    %48 = arith.mulf %47, %47 : vector<8x128xf32>
    %cst_27 = arith.constant dense<0.000000e+00> : vector<8xf32>
    %49 = vector.multi_reduction <add>, %48, %cst_27 [1] : vector<8x128xf32> to vector<8xf32>
    %50 = vector.shape_cast %49 : vector<8xf32> to vector<8x1xf32>
    %cst_28 = arith.constant 3.125000e-02 : f32
    %51 = vector.broadcast %cst_28 : f32 to vector<8x1xf32>
    %52 = arith.mulf %50, %51 : vector<8x1xf32>
    %cst_29 = arith.constant 9.99999974E-6 : f32
    %53 = vector.broadcast %cst_29 : f32 to vector<8x1xf32>
    %54 = arith.addf %52, %53 : vector<8x1xf32>
    %55 = math.rsqrt %54 : vector<8x1xf32>
    %56 = vector.broadcast %55 : vector<8x1xf32> to vector<8x128xf32>
    %57 = arith.mulf %47, %56 : vector<8x128xf32>
    %58 = vector.broadcast %38 : vector<1x128xf32> to vector<8x128xf32>
    %59 = arith.mulf %57, %58 : vector<8x128xf32>
    %60 = vector.broadcast %39 : vector<1x128xf32> to vector<8x128xf32>
    %61 = arith.addf %59, %60 : vector<8x128xf32>
    %c0_30 = arith.constant 0 : index
    %c0_31 = arith.constant 0 : index
    %62 = vector.load %arg1[%c0_30, %c0_31] : memref<8x128xf32, #tpu.memory_space<vmem>>, vector<8x128xf32>
    %cst_32 = arith.constant 0.000000e+00 : f32
    %63 = vector.broadcast %cst_32 : f32 to vector<8x128xf32>
    %64 = arith.maximumf %61, %63 : vector<8x128xf32>
    %65 = arith.addf %62, %64 : vector<8x128xf32>
    %c0_33 = arith.constant 0 : index
    %c0_34 = arith.constant 0 : index
    %66 = vector.load %arg10[%c0_33, %c0_34] : memref<8x128xf32, #tpu.memory_space<vmem>>, vector<8x128xf32>
    tpu.vector_store %arg10[%c0_33, %c0_34], %65 {strides = array<i32>} : memref<8x128xf32, #tpu.memory_space<vmem>>, vector<8x128xf32>,
    return
  }
  func.func @transform_0(%arg0: i32) -> (i32, i32) {
    %c0_i32 = arith.constant 0 : i32
    %c0_i32_0 = arith.constant 0 : i32
    return %arg0, %c0_i32 : i32, i32
  }
  func.func @transform_1(%arg0: i32) -> (i32, i32) {
    %c0_i32 = arith.constant 0 : i32
    %c0_i32_0 = arith.constant 0 : i32
    %c0_i32_1 = arith.constant 0 : i32
    return %c0_i32, %c0_i32_0 : i32, i32
  }
  func.func @transform_2(%arg0: i32) -> (i32, i32) {
    %c0_i32 = arith.constant 0 : i32
    %c0_i32_0 = arith.constant 0 : i32
    %c0_i32_1 = arith.constant 0 : i32
    return %c0_i32, %c0_i32_0 : i32, i32
  }
  func.func @transform_3(%arg0: i32) -> (i32, i32) {
    %c0_i32 = arith.constant 0 : i32
    %c0_i32_0 = arith.constant 0 : i32
    %c0_i32_1 = arith.constant 0 : i32
    return %c0_i32, %c0_i32_0 : i32, i32
  }
  func.func @transform_4(%arg0: i32) -> (i32, i32) {
    %c0_i32 = arith.constant 0 : i32
    %c0_i32_0 = arith.constant 0 : i32
    %c0_i32_1 = arith.constant 0 : i32
    return %c0_i32, %c0_i32_0 : i32, i32
  }
  func.func @transform_5(%arg0: i32) -> (i32, i32) {
    %c0_i32 = arith.constant 0 : i32
    %c0_i32_0 = arith.constant 0 : i32
    %c0_i32_1 = arith.constant 0 : i32
    return %c0_i32, %c0_i32_0 : i32, i32
  }
  func.func @transform_6(%arg0: i32) -> (i32, i32) {
    %c0_i32 = arith.constant 0 : i32
    %c0_i32_0 = arith.constant 0 : i32
    %c0_i32_1 = arith.constant 0 : i32
    return %c0_i32, %c0_i32_0 : i32, i32
  }
  func.func @transform_7(%arg0: i32) -> (i32, i32) {
    %c0_i32 = arith.constant 0 : i32
    %c0_i32_0 = arith.constant 0 : i32
    %c0_i32_1 = arith.constant 0 : i32
    return %c0_i32, %c0_i32_0 : i32, i32
  }
  func.func @transform_8(%arg0: i32) -> (i32, i32) {
    %c0_i32 = arith.constant 0 : i32
    %c0_i32_0 = arith.constant 0 : i32
    %c0_i32_1 = arith.constant 0 : i32
    return %c0_i32, %c0_i32_0 : i32, i32
  }
  func.func @transform_9(%arg0: i32) -> (i32, i32) {
    %c0_i32 = arith.constant 0 : i32
    %c0_i32_0 = arith.constant 0 : i32
    return %arg0, %c0_i32 : i32, i32
  }
}

module attributes {stable_mosaic.version = 11 : i64} {
  func.func @resblock_kernel(%arg0: i32, %arg1: memref<8x128xf32, #tpu.memory_space<vmem>>, %arg2: memref<128x128xf32, #tpu.memory_space<vmem>>, %arg3: memref<1x128xf32, #tpu.memory_space<vmem>>, %arg4: memref<1x128xf32, #tpu.memory_space<vmem>>, %arg5: memref<1x128xf32, #tpu.memory_space<vmem>>, %arg6: memref<128x128xf32, #tpu.memory_space<vmem>>, %arg7: memref<1x128xf32, #tpu.memory_space<vmem>>, %arg8: memref<1x128xf32, #tpu.memory_space<vmem>>, %arg9: memref<1x128xf32, #tpu.memory_space<vmem>>, %arg10: memref<8x128xf32, #tpu.memory_space<vmem>>) attributes {dimension_semantics = [#tpu.dimension_semantics<parallel>], iteration_bounds = array<i64: 1>, scalar_prefetch = 0 : i64, scratch_operands = 0 : i64, tpu.core_type = #tpu.core_type<tc>, window_params = [{transform_indices = @transform_0, window_bounds = array<i64: 8, 128>}, {pipeline_mode = #tpu.pipeline_mode<synchronous>, transform_indices = @transform_1, window_bounds = array<i64: 128, 128>}, {pipeline_mode = #tpu.pipeline_mode<synchronous>, transform_indices = @transform_2, window_bounds = array<i64: 1, 128>}, {pipeline_mode = #tpu.pipeline_mode<synchronous>, transform_indices = @transform_3, window_bounds = array<i64: 1, 128>}, {pipeline_mode = #tpu.pipeline_mode<synchronous>, transform_indices = @transform_4, window_bounds = array<i64: 1, 128>}, {pipeline_mode = #tpu.pipeline_mode<synchronous>, transform_indices = @transform_5, window_bounds = array<i64: 128, 128>}, {pipeline_mode = #tpu.pipeline_mode<synchronous>, transform_indices = @transform_6, window_bounds = array<i64: 1, 128>}, {pipeline_mode = #tpu.pipeline_mode<synchronous>, transform_indices = @transform_7, window_bounds = array<i64: 1, 128>}, {pipeline_mode = #tpu.pipeline_mode<synchronous>, transform_indices = @transform_8, window_bounds = array<i64: 1, 128>}, {transform_indices = @transform_9, window_bounds = array<i64: 8, 128>}]} {
    %0 = tpu.iota {dimensions = array<i32: 1>} : vector<8x128xi32>
    %c32_i32 = arith.constant 32 : i32
    %1 = vector.broadcast %c32_i32 : i32 to vector<8x128xi32>
    %2 = arith.cmpi slt, %0, %1 : vector<8x128xi32>
    %c0 = arith.constant 0 : index
    %c0_0 = arith.constant 0 : index
    %3 = vector.load %arg1[%c0, %c0_0] : memref<8x128xf32, #tpu.memory_space<vmem>>, vector<8x128xf32>
    %c0_1 = arith.constant 0 : index
    %c0_2 = arith.constant 0 : index
    %4 = vector.load %arg2[%c0_1, %c0_2] : memref<128x128xf32, #tpu.memory_space<vmem>>, vector<128x128xf32>
    %cst = arith.constant dense<0.000000e+00> : vector<8x128xf32>
    %5 = tpu.matmul %3, %4, %cst {dimension_numbers = #tpu.dot_dimension_numbers<[1], [0], [0], [1], [0, 0, 1, 1], [], []>} : vector<8x128xf32>, vector<128x128xf32>, vector<8x128xf32> -> vector<8x128xf32>
    %c0_3 = arith.constant 0 : index
    %c0_4 = arith.constant 0 : index
    %6 = vector.load %arg3[%c0_3, %c0_4] : memref<1x128xf32, #tpu.memory_space<vmem>>, vector<1x128xf32>
    %7 = vector.broadcast %6 : vector<1x128xf32> to vector<8x128xf32>
    %8 = arith.addf %5, %7 : vector<8x128xf32>
    %c0_5 = arith.constant 0 : index
    %c0_6 = arith.constant 0 : index
    %9 = vector.load %arg4[%c0_5, %c0_6] : memref<1x128xf32, #tpu.memory_space<vmem>>, vector<1x128xf32>
    %c0_7 = arith.constant 0 : index
    %c0_8 = arith.constant 0 : index
    %10 = vector.load %arg5[%c0_7, %c0_8] : memref<1x128xf32, #tpu.memory_space<vmem>>, vector<1x128xf32>
    %cst_9 = arith.constant dense<0.000000e+00> : vector<8xf32>
    %11 = vector.multi_reduction <add>, %8, %cst_9 [1] : vector<8x128xf32> to vector<8xf32>
    %12 = vector.shape_cast %11 : vector<8xf32> to vector<8x1xf32>
    %cst_10 = arith.constant 3.125000e-02 : f32
    %13 = vector.broadcast %cst_10 : f32 to vector<8x1xf32>
    %14 = arith.mulf %12, %13 : vector<8x1xf32>
    %15 = vector.broadcast %14 : vector<8x1xf32> to vector<8x128xf32>
    %16 = arith.subf %8, %15 : vector<8x128xf32>
    %cst_11 = arith.constant 0.000000e+00 : f32
    %17 = vector.broadcast %cst_11 : f32 to vector<8x128xf32>
    %18 = arith.select %2, %16, %17 : vector<8x128xi1>, vector<8x128xf32>
    %19 = arith.mulf %18, %18 : vector<8x128xf32>
    %cst_12 = arith.constant dense<0.000000e+00> : vector<8xf32>
    %20 = vector.multi_reduction <add>, %19, %cst_12 [1] : vector<8x128xf32> to vector<8xf32>
    %21 = vector.shape_cast %20 : vector<8xf32> to vector<8x1xf32>
    %cst_13 = arith.constant 3.125000e-02 : f32
    %22 = vector.broadcast %cst_13 : f32 to vector<8x1xf32>
    %23 = arith.mulf %21, %22 : vector<8x1xf32>
    %cst_14 = arith.constant 9.99999974E-6 : f32
    %24 = vector.broadcast %cst_14 : f32 to vector<8x1xf32>
    %25 = arith.addf %23, %24 : vector<8x1xf32>
    %26 = math.rsqrt %25 : vector<8x1xf32>
    %27 = vector.broadcast %26 : vector<8x1xf32> to vector<8x128xf32>
    %28 = arith.mulf %18, %27 : vector<8x128xf32>
    %29 = vector.broadcast %9 : vector<1x128xf32> to vector<8x128xf32>
    %30 = arith.mulf %28, %29 : vector<8x128xf32>
    %31 = vector.broadcast %10 : vector<1x128xf32> to vector<8x128xf32>
    %32 = arith.addf %30, %31 : vector<8x128xf32>
    %c0_15 = arith.constant 0 : index
    %c0_16 = arith.constant 0 : index
    %33 = vector.load %arg6[%c0_15, %c0_16] : memref<128x128xf32, #tpu.memory_space<vmem>>, vector<128x128xf32>
    %cst_17 = arith.constant dense<0.000000e+00> : vector<8x128xf32>
    %34 = tpu.matmul %32, %33, %cst_17 {dimension_numbers = #tpu.dot_dimension_numbers<[1], [0], [0], [1], [0, 0, 1, 1], [], []>} : vector<8x128xf32>, vector<128x128xf32>, vector<8x128xf32> -> vector<8x128xf32>
    %c0_18 = arith.constant 0 : index
    %c0_19 = arith.constant 0 : index
    %35 = vector.load %arg7[%c0_18, %c0_19] : memref<1x128xf32, #tpu.memory_space<vmem>>, vector<1x128xf32>
    %36 = vector.broadcast %35 : vector<1x128xf32> to vector<8x128xf32>
    %37 = arith.addf %34, %36 : vector<8x128xf32>
    %c0_20 = arith.constant 0 : index
    %c0_21 = arith.constant 0 : index
    %38 = vector.load %arg8[%c0_20, %c0_21] : memref<1x128xf32, #tpu.memory_space<vmem>>, vector<1x128xf32>
    %c0_22 = arith.constant 0 : index
    %c0_23 = arith.constant 0 : index
    %39 = vector.load %arg9[%c0_22, %c0_23] : memref<1x128xf32, #tpu.memory_space<vmem>>, vector<1x128xf32>
    %cst_24 = arith.constant dense<0.000000e+00> : vector<8xf32>
    %40 = vector.multi_reduction <add>, %37, %cst_24 [1] : vector<8x128xf32> to vector<8xf32>
    %41 = vector.shape_cast %40 : vector<8xf32> to vector<8x1xf32>
    %cst_25 = arith.constant 3.125000e-02 : f32
    %42 = vector.broadcast %cst_25 : f32 to vector<8x1xf32>
    %43 = arith.mulf %41, %42 : vector<8x1xf32>
    %44 = vector.broadcast %43 : vector<8x1xf32> to vector<8x128xf32>
    %45 = arith.subf %37, %44 : vector<8x128xf32>
    %cst_26 = arith.constant 0.000000e+00 : f32
    %46 = vector.broadcast %cst_26 : f32 to vector<8x128xf32>
    %47 = arith.select %2, %45, %46 : vector<8x128xi1>, vector<8x128xf32>
    %48 = arith.mulf %47, %47 : vector<8x128xf32>
    %cst_27 = arith.constant dense<0.000000e+00> : vector<8xf32>
    %49 = vector.multi_reduction <add>, %48, %cst_27 [1] : vector<8x128xf32> to vector<8xf32>
    %50 = vector.shape_cast %49 : vector<8xf32> to vector<8x1xf32>
    %cst_28 = arith.constant 3.125000e-02 : f32
    %51 = vector.broadcast %cst_28 : f32 to vector<8x1xf32>
    %52 = arith.mulf %50, %51 : vector<8x1xf32>
    %cst_29 = arith.constant 9.99999974E-6 : f32
    %53 = vector.broadcast %cst_29 : f32 to vector<8x1xf32>
    %54 = arith.addf %52, %53 : vector<8x1xf32>
    %55 = math.rsqrt %54 : vector<8x1xf32>
    %56 = vector.broadcast %55 : vector<8x1xf32> to vector<8x128xf32>
    %57 = arith.mulf %47, %56 : vector<8x128xf32>
    %58 = vector.broadcast %38 : vector<1x128xf32> to vector<8x128xf32>
    %59 = arith.mulf %57, %58 : vector<8x128xf32>
    %60 = vector.broadcast %39 : vector<1x128xf32> to vector<8x128xf32>
    %61 = arith.addf %59, %60 : vector<8x128xf32>
    %c0_30 = arith.constant 0 : index
    %c0_31 = arith.constant 0 : index
    %62 = vector.load %arg1[%c0_30, %c0_31] : memref<8x128xf32, #tpu.memory_space<vmem>>, vector<8x128xf32>
    %cst_32 = arith.constant 0.000000e+00 : f32
    %63 = vector.broadcast %cst_32 : f32 to vector<8x128xf32>
    %64 = arith.maximumf %61, %63 : vector<8x128xf32>
    %65 = arith.addf %62, %64 : vector<8x128xf32>
    %c0_33 = arith.constant 0 : index
    %c0_34 = arith.constant 0 : index
    %66 = vector.load %arg10[%c0_33, %c0_34] : memref<8x128xf32, #tpu.memory_space<vmem>>, vector<8x128xf32>
    tpu.vector_store %arg10[%c0_33, %c0_34], %65 {strides = array<i32>} : memref<8x128xf32, #tpu.memory_space<vmem>>, vector<8x128xf32>,
    return
  }
  func.func @transform_0(%arg0: i32) -> (i32, i32) {
    %c0_i32 = arith.constant 0 : i32
    %c0_i32_0 = arith.constant 0 : i32
    return %arg0, %c0_i32 : i32, i32
  }
  func.func @transform_1(%arg0: i32) -> (i32, i32) {
    %c0_i32 = arith.constant 0 : i32
    %c0_i32_0 = arith.constant 0 : i32
    %c0_i32_1 = arith.constant 0 : i32
    return %c0_i32, %c0_i32_0 : i32, i32
  }
  func.func @transform_2(%arg0: i32) -> (i32, i32) {
    %c0_i32 = arith.constant 0 : i32
    %c0_i32_0 = arith.constant 0 : i32
    %c0_i32_1 = arith.constant 0 : i32
    return %c0_i32, %c0_i32_0 : i32, i32
  }
  func.func @transform_3(%arg0: i32) -> (i32, i32) {
    %c0_i32 = arith.constant 0 : i32
    %c0_i32_0 = arith.constant 0 : i32
    %c0_i32_1 = arith.constant 0 : i32
    return %c0_i32, %c0_i32_0 : i32, i32
  }
  func.func @transform_4(%arg0: i32) -> (i32, i32) {
    %c0_i32 = arith.constant 0 : i32
    %c0_i32_0 = arith.constant 0 : i32
    %c0_i32_1 = arith.constant 0 : i32
    return %c0_i32, %c0_i32_0 : i32, i32
  }
  func.func @transform_5(%arg0: i32) -> (i32, i32) {
    %c0_i32 = arith.constant 0 : i32
    %c0_i32_0 = arith.constant 0 : i32
    %c0_i32_1 = arith.constant 0 : i32
    return %c0_i32, %c0_i32_0 : i32, i32
  }
  func.func @transform_6(%arg0: i32) -> (i32, i32) {
    %c0_i32 = arith.constant 0 : i32
    %c0_i32_0 = arith.constant 0 : i32
    %c0_i32_1 = arith.constant 0 : i32
    return %c0_i32, %c0_i32_0 : i32, i32
  }
  func.func @transform_7(%arg0: i32) -> (i32, i32) {
    %c0_i32 = arith.constant 0 : i32
    %c0_i32_0 = arith.constant 0 : i32
    %c0_i32_1 = arith.constant 0 : i32
    return %c0_i32, %c0_i32_0 : i32, i32
  }
  func.func @transform_8(%arg0: i32) -> (i32, i32) {
    %c0_i32 = arith.constant 0 : i32
    %c0_i32_0 = arith.constant 0 : i32
    %c0_i32_1 = arith.constant 0 : i32
    return %c0_i32, %c0_i32_0 : i32, i32
  }
  func.func @transform_9(%arg0: i32) -> (i32, i32) {
    %c0_i32 = arith.constant 0 : i32
    %c0_i32_0 = arith.constant 0 : i32
    return %arg0, %c0_i32 : i32, i32
  }
}

</mosaic_0001>

<bundles_post_ra>
// kernel: tpu_custom_call.1
= control target key start
LH: loop header
LB: loop body
LE: loop exit
PB: predicated region body
PF: predicated region fallthrough
CT: control target
= control target key end

     0   :  { %14 = vsyncpa [#allocation3], 0  ;;  %s755_s0 = inlined_call_operand.hbm [shape: f32[8,128], index: 0, kind: input, shape index: {}]   ;;  %s756_s1 = inlined_call_operand.hbm [shape: f32[128,128], index: 1, kind: input, shape index: {}]   ;;  %s757_s2 = inlined_call_operand.vmem [shape: f32[1,128], index: 2, kind: input, shape index: {}]   ;;  %s758_s3 = inlined_call_operand.vmem [shape: f32[1,128], index: 3, kind: input, shape index: {}]   ;;  %s759_s4 = inlined_call_operand.vmem [shape: f32[1,128], index: 4, kind: input, shape index: {}]   ;;  %s760_s5 = inlined_call_operand.hbm [shape: f32[128,128], index: 5, kind: input, shape index: {}]   ;;  %s761_s6 = inlined_call_operand.vmem [shape: f32[1,128], index: 6, kind: input, shape index: {}]   ;;  %s762_s7 = inlined_call_operand.vmem [shape: f32[1,128], index: 7, kind: input, shape index: {}]   ;;  %s763_s8 = inlined_call_operand.vmem [shape: f32[1,128], index: 8, kind: input, shape index: {}]   ;;  %s764_s9 = inlined_call_operand.hbm [shape: f32[8,128], index: 9, kind: output, shape index: {}]  }
   0x1   :  { %15 = vsyncpa [#allocation6], 0 }
   0x2   :  { %16 = vsyncpa [#allocation4], 0  ;;  %s602_s30 = smov [#allocation5]   ;;  %s508_s13 = scalar_lea.hbm %s756_s1, 2048 }
   0x3   :  { %s32_s10 = sshll.u32 %s602_s30, 4  ;;  %p509_p0 = scmp.ne.s32.totalorder %s756_s1, %s508_s13  ;;  %s33_s10 = int_to_ptr.vmem [resolvable:$true] %s32_s10 }
   0x4   :  { %p512_p1 = scmp.lt.u32.totalorder %s508_s13, %s756_s1 }
   0x6   :  { %p514_p2 = pnand %p512_p1, %p509_p0 }
   0x8   :  { %517 = shalt.err (!%p514_p2)
}
   0x9   :  { %s518_s18 = scalar_lea.vmem %s33_s10, 2048  ;;  %p523_p4 = scmp.lt.s32.totalorder %s33_s10, %s33_s10 }
   0xa   :  { %p519_p3 = scmp.ne.s32.totalorder %s33_s10, %s518_s18  ;;  %p524_p5 = scmp.lt.s32.totalorder %s518_s18, %s518_s18 }
   0xc   :  { %p525_p6 = por %p524_p5, %p523_p4 }
   0xe   :  { %p526_p7 = pnand %p525_p6, %p519_p3 }
  0x10   :  { %529 = shalt.err (!%p526_p7)
}
  0x11   :  { %s603_s19 = smov 128   ;;  %s604_s20 = smov 8  }
  0x12   :  { %38 = dma.hbm_to_vmem [thread:$0]  %s756_s1, 2048, %s33_s10, [#allocation6], %s603_s19, %s603_s19, %s604_s20  }
  0x13   :  { %s605_s23 = smov [#allocation2]   ;;  %s606_s25 = smov [#allocation7]  }
  0x14   :  { %s23_s24 = sshll.u32 %s605_s23, 4  ;;  %s50_s26 = sshll.u32 %s606_s25, 4  ;;  %s24_s24 = int_to_ptr.vmem [resolvable:$true] %s23_s24  ;;  %s51_s26 = int_to_ptr.vmem [resolvable:$true] %s50_s26 }
  0x15   :  { %s530_s29 = scalar_lea.hbm %s755_s0, 128 }
  0x16   :  { %p531_p8 = scmp.ne.s32.totalorder %s755_s0, %s530_s29  ;;  %p534_p9 = scmp.lt.u32.totalorder %s530_s29, %s755_s0 }
  0x18   :  { %p536_p10 = pnand %p534_p9, %p531_p8 }
  0x1a   :  { %539 = shalt.err (!%p536_p10)
}
  0x1b   :  { %s540_s1 = scalar_lea.vmem %s24_s24, 128  ;;  %p545_p12 = scmp.lt.s32.totalorder %s24_s24, %s24_s24 }
  0x1c   :  { %p541_p11 = scmp.ne.s32.totalorder %s24_s24, %s540_s1  ;;  %p546_p13 = scmp.lt.s32.totalorder %s540_s1, %s540_s1 }
  0x1e   :  { %p547_p0 = por %p546_p13, %p545_p12 }
  0x20   :  { %p548_p1 = pnand %p547_p0, %p541_p11 }
  0x22   :  { %551 = shalt.err (!%p548_p1)
}
  0x23   :  { %26 = dma.hbm_to_vmem [thread:$0]  %s755_s0, 128, %s24_s24, [#allocation3]  }
  0x24   :  { %s552_s17 = scalar_lea.hbm %s760_s5, 2048 }
  0x25   :  { %p553_p2 = scmp.ne.s32.totalorder %s760_s5, %s552_s17  ;;  %p556_p3 = scmp.lt.u32.totalorder %s552_s17, %s760_s5 }
  0x27   :  { %p558_p4 = pnand %p556_p3, %p553_p2 }
  0x29   :  { %561 = shalt.err (!%p558_p4)
}
  0x2a   :  { %s562_s25 = scalar_lea.vmem %s51_s26, 2048  ;;  %p567_p6 = scmp.lt.s32.totalorder %s51_s26, %s51_s26 }
  0x2b   :  { %p563_p5 = scmp.ne.s32.totalorder %s51_s26, %s562_s25  ;;  %p568_p7 = scmp.lt.s32.totalorder %s562_s25, %s562_s25 }
  0x2d   :  { %p569_p8 = por %p568_p7, %p567_p6 }
  0x2f   :  { %p570_p9 = pnand %p569_p8, %p563_p5 }
  0x31   :  { %573 = shalt.err (!%p570_p9)
}
  0x32   :  { %56 = dma.hbm_to_vmem [thread:$0]  %s760_s5, 2048, %s51_s26, [#allocation6], %s603_s19, %s603_s19, %s604_s20  }
  0x33   :  { %596 = dma.done.wait [#allocation3], 128  }
  0x34   :  { %597 = vsyncadd [#allocation3], 4294967168 }
  0x35   :  { %598 = dma.done.wait [#allocation6], 4096  }
  0x36   :  { %599 = vsyncadd [#allocation6], 4294963200  ;;  %v607_v0 = vmov 0.0|0.0   ;;  %vm608_vm0 = vmmov 0   ;;  %v609_v1 = vmov 0.0   ;;  %v76_v2 = vld [vmem:[#allocation5] sm:$0xff]  ;;  %v72_v40 = vlaneseq }
  0x37   :  { %447 = vmatprep.subr.bf16.mxu0 %v607_v0  ;;  %409 = vmatprep.mubr.msk.f32.mxu0 %vm608_vm0, %v609_v1  ;;  %v77_v3 = vld [vmem:[#allocation5 + $0x8] sm:$0xff]  ;;  %v78_v4 = vld [vmem:[#allocation5 + $0x10] sm:$0xff]  ;;  %v79_v6 = vld [vmem:[#allocation5 + $0x18] sm:$0xff]  ;;  %s610_s11 = smov [#allocation8]  }
  0x38   :  { %471 = vmatprep.subr.bf16.mxu1 %v607_v0  ;;  %444 = vmatprep.mubr.msk.f32.mxu1 %vm608_vm0, %v609_v1  ;;  %v448_v5 = vpack.c.bf16 %v77_v3, %v76_v2  ;;  %v451_v7 = vpack.c.bf16 %v79_v6, %v78_v4  ;;  %v80_v8 = vld [vmem:[#allocation5 + $0x20] sm:$0xff]  ;;  %v81_v9 = vld [vmem:[#allocation5 + $0x28] sm:$0xff]  ;;  %v82_v11 = vld [vmem:[#allocation5 + $0x30] sm:$0xff]  ;;  %v73_v41 = vand.u32 127, %v72_v40  ;;  %s327_s12 = sshll.u32 %s610_s11, 4  ;;  %s328_s12 = int_to_ptr.vmem [resolvable:$true] %s327_s12 }
  0x39   :  { %v454_v10 = vpack.c.bf16 %v81_v9, %v80_v8  ;;  %v83_v12 = vld [vmem:[#allocation5 + $0x38] sm:$0xff]  ;;  %v84_v14 = vld [vmem:[#allocation5 + $0x40] sm:$0xff]  ;;  %v85_v15 = vld [vmem:[#allocation5 + $0x48] sm:$0xff]  ;;  %s574_s13 = scalar_lea.vmem %s328_s12, 128  ;;  %p579_p11 = scmp.lt.s32.totalorder %s328_s12, %s328_s12 }
  0x3a   :  { %449 = vmatpush3.bf16.msra.mxu0 %v448_v5  ;;  %v457_v13 = vpack.c.bf16 %v83_v12, %v82_v11  ;;  %v460_v16 = vpack.c.bf16 %v85_v15, %v84_v14  ;;  %v86_v17 = vld [vmem:[#allocation5 + $0x50] sm:$0xff]  ;;  %v87_v18 = vld [vmem:[#allocation5 + $0x58] sm:$0xff]  ;;  %v88_v20 = vld [vmem:[#allocation5 + $0x60] sm:$0xff]  ;;  %vm74_vm1 = vcmp.lt.s32.totalorder %v73_v41, 32  ;;  %p575_p10 = scmp.ne.s32.totalorder %s328_s12, %s574_s13  ;;  %p580_p12 = scmp.lt.s32.totalorder %s574_s13, %s574_s13 }
  0x3b   :  { %450 = vmatprep.subr.bf16.mxu0 %v607_v0  ;;  %v463_v19 = vpack.c.bf16 %v87_v18, %v86_v17  ;;  %v89_v21 = vld [vmem:[#allocation5 + $0x68] sm:$0xff]  ;;  %v90_v23 = vld [vmem:[#allocation5 + $0x70] sm:$0xff]  ;;  %v91_v24 = vld [vmem:[#allocation5 + $0x78] sm:$0xff] }
  0x3c   :  { %v466_v22 = vpack.c.bf16 %v89_v21, %v88_v20  ;;  %v469_v25 = vpack.c.bf16 %v91_v24, %v90_v23  ;;  %v712_v26 = vld [vmem:[#allocation2] sm:$0xff]  ;;  %v197_v31 = vld [vmem:[#allocation7] sm:$0xff]  ;;  %v198_v32 = vld [vmem:[#allocation7 + $0x8] sm:$0xff]  ;;  %p581_p13 = por %p580_p12, %p579_p11 }
  0x3d   :  { %v337_v27 = vld [vmem:[%s757_s2] ss:$0 sm:$0xff]  ;;  %v199_v33 = vld [vmem:[#allocation7 + $0x10] sm:$0xff]  ;;  %v472_v34 = vpack.c.bf16 %v198_v32, %v197_v31  ;;  %v201_v37 = vld [vmem:[#allocation7 + $0x20] sm:$0xff] }
  0x3e   :  { %452 = vmatpush3.bf16.msra.mxu0 %v451_v7  ;;  %v200_v35 = vld [vmem:[#allocation7 + $0x18] sm:$0xff]  ;;  %v202_v38 = vld [vmem:[#allocation7 + $0x28] sm:$0xff]  ;;  %v203_v47 = vld [vmem:[#allocation7 + $0x30] sm:$0xff]  ;;  %p582_p0 = pnand %p581_p13, %p575_p10 }
  0x3f   :  { %453 = vmatprep.subr.bf16.mxu0 %v607_v0  ;;  %473 = vmatpush3.bf16.msra.mxu1 %v472_v34  ;;  %v475_v36 = vpack.c.bf16 %v200_v35, %v199_v33  ;;  %v478_v39 = vpack.c.bf16 %v202_v38, %v201_v37  ;;  %v204_v48 = vld [vmem:[#allocation7 + $0x38] sm:$0xff]  ;;  %v205_v50 = vld [vmem:[#allocation7 + $0x40] sm:$0xff]  ;;  %v206_v51 = vld [vmem:[#allocation7 + $0x48] sm:$0xff] }
  0x40   :  { %474 = vmatprep.subr.bf16.mxu1 %v607_v0  ;;  %v481_v49 = vpack.c.bf16 %v204_v48, %v203_v47  ;;  %v484_v52 = vpack.c.bf16 %v206_v51, %v205_v50  ;;  %v207_v53 = vld [vmem:[#allocation7 + $0x50] sm:$0xff]  ;;  %v208_v54 = vld [vmem:[#allocation7 + $0x58] sm:$0xff]  ;;  %v209_v56 = vld [vmem:[#allocation7 + $0x60] sm:$0xff] }
  0x41   :  { %v487_v55 = vpack.c.bf16 %v208_v54, %v207_v53  ;;  %v210_v57 = vld [vmem:[#allocation7 + $0x68] sm:$0xff]  ;;  %v211_v59 = vld [vmem:[#allocation7 + $0x70] sm:$0xff]  ;;  %v212_v60 = vld [vmem:[#allocation7 + $0x78] sm:$0xff] }
  0x42   :  { %455 = vmatpush3.bf16.msra.mxu0 %v454_v10  ;;  %v490_v58 = vpack.c.bf16 %v210_v57, %v209_v56  ;;  %v493_v61 = vpack.c.bf16 %v212_v60, %v211_v59  ;;  %v338_v3 = vld [vmem:[%s758_s3] ss:$0 sm:$0xff] }
  0x43   :  { %456 = vmatprep.subr.bf16.mxu0 %v607_v0  ;;  %476 = vmatpush3.bf16.msra.mxu1 %v475_v36  ;;  %v339_v5 = vld [vmem:[%s759_s4] ss:$0 sm:$0xff] }
  0x44   :  { %477 = vmatprep.subr.bf16.mxu1 %v607_v0  ;;  %v341_v20 = vld [vmem:[%s762_s7] ss:$0 sm:$0xff] }
  0x46   :  { %458 = vmatpush3.bf16.msra.mxu0 %v457_v13 }
  0x47   :  { %459 = vmatprep.subr.bf16.mxu0 %v607_v0  ;;  %479 = vmatpush3.bf16.msra.mxu1 %v478_v39 }
  0x48   :  { %480 = vmatprep.subr.bf16.mxu1 %v607_v0 }
  0x4a   :  { %461 = vmatpush3.bf16.msra.mxu0 %v460_v16 }
  0x4b   :  { %462 = vmatprep.subr.bf16.mxu0 %v607_v0  ;;  %482 = vmatpush3.bf16.msra.mxu1 %v481_v49 }
  0x4c   :  { %483 = vmatprep.subr.bf16.mxu1 %v607_v0 }
  0x4e   :  { %464 = vmatpush3.bf16.msra.mxu0 %v463_v19 }
  0x4f   :  { %465 = vmatprep.subr.bf16.mxu0 %v607_v0  ;;  %485 = vmatpush3.bf16.msra.mxu1 %v484_v52 }
  0x50   :  { %486 = vmatprep.subr.bf16.mxu1 %v607_v0 }
  0x52   :  { %467 = vmatpush3.bf16.msra.mxu0 %v466_v22  ;;  %v342_v22 = vld [vmem:[%s763_s8] ss:$0 sm:$0xff] }
  0x53   :  { %468 = vmatprep.subr.bf16.mxu0 %v607_v0  ;;  %488 = vmatpush3.bf16.msra.mxu1 %v487_v55 }
  0x54   :  { %489 = vmatprep.subr.bf16.mxu1 %v607_v0 }
  0x56   :  { %470 = vmatpush3.bf16.msra.mxu0 %v469_v25 }
  0x57   :  { %491 = vmatpush3.bf16.msra.mxu1 %v490_v58 }
  0x58   :  { %492 = vmatprep.subr.bf16.mxu1 %v607_v0  ;;  %v340_v0 = vld [vmem:[%s761_s6] ss:$0 sm:$0xff] }
  0x59   :  { %410 = vmatmul.mubr.f32.vlgmr.msra.gmra.mrb[0].mxu0 %v712_v26 }
  0x5b   :  { %494 = vmatpush3.bf16.msra.mxu1 %v493_v61 }
 0x12c   :  { %v165_v28 = vpop.f32.mrb[0].mxu0 }
 0x12d   :  { %v166_v29 = vadd.f32 %v337_v27, %v165_v28  ;;  %v411_v30 = vpop.f32.mrb[1].mxu0 }
 0x12f   :  { %171 = vadd.xlane.f32.xlu0 %v166_v29 }
 0x1bc   :  { %v172_v42 = vpop.xlane.xlu0 %171 }
 0x1bd   :  { %v173_v43 = vmul.f32 0.03125, %v172_v42 }
 0x1bf   :  { %v174_v44 = vsub.f32 %v166_v29, %v173_v43 }
 0x1c1   :  { %v175_v45 = vsel %vm74_vm1, %v174_v44, 0.0 }
 0x1c2   :  { %v176_v46 = vmul.f32 %v175_v45, %v175_v45 }
 0x1c4   :  { %177 = vadd.xlane.f32.xlu0 %v176_v46 }
 0x251   :  { %v178_v62 = vpop.xlane.xlu0 %177 }
 0x252   :  { %v179_v63 = vmul.f32 0.03125, %v178_v62 }
 0x254   :  { %v180_v1 = vadd.f32 1e-05, %v179_v63 }
 0x256   :  { %504 = vrsqrt.f32 %v180_v1 }
 0x260   :  { %v505_v2 = vpop.eup %504 }
 0x261   :  { %v182_v4 = vmul.f32 %v505_v2, %v175_v45 }
 0x263   :  { %v189_v6 = vmul.f32 %v338_v3, %v182_v4 }
 0x265   :  { %v196_v7 = vadd.f32 %v339_v5, %v189_v6 }
 0x267   :  { %445 = vmatmul.mubr.f32.vlgmr.msra.gmra.mrb[0].mxu1 %v196_v7 }
 0x33a   :  { %v286_v8 = vpop.f32.mrb[0].mxu1 }
 0x33b   :  { %v287_v9 = vadd.f32 %v340_v0, %v286_v8  ;;  %v446_v10 = vpop.f32.mrb[1].mxu1 }
 0x33d   :  { %292 = vadd.xlane.f32.xlu1 %v287_v9 }
 0x3ca   :  { %v293_v11 = vpop.xlane.xlu1 %292 }
 0x3cb   :  { %v294_v12 = vmul.f32 0.03125, %v293_v11 }
 0x3cd   :  { %v295_v13 = vsub.f32 %v287_v9, %v294_v12 }
 0x3cf   :  { %v296_v14 = vsel %vm74_vm1, %v295_v13, 0.0 }
 0x3d0   :  { %v297_v15 = vmul.f32 %v296_v14, %v296_v14 }
 0x3d2   :  { %298 = vadd.xlane.f32.xlu1 %v297_v15 }
 0x45f   :  { %v299_v16 = vpop.xlane.xlu1 %298 }
 0x460   :  { %v300_v17 = vmul.f32 0.03125, %v299_v16 }
 0x462   :  { %v301_v18 = vadd.f32 1e-05, %v300_v17 }
 0x464   :  { %506 = vrsqrt.f32 %v301_v18 }
 0x46e   :  { %v507_v19 = vpop.eup %506 }
 0x46f   :  { %v303_v21 = vmul.f32 %v507_v19, %v296_v14 }
 0x471   :  { %v310_v23 = vmul.f32 %v341_v20, %v303_v21 }
 0x473   :  { %v317_v24 = vadd.f32 %v342_v22, %v310_v23 }
 0x475   :  { %v318_v25 = vmax.f32 %v317_v24, 0.0 }
 0x477   :  { %v319_v27 = vadd.f32 %v318_v25, %v712_v26 }
 0x479   :  { %320 = vst [vmem:[#allocation8] sm:$0xff] %v319_v27 }
 0x47a   :  { %585 = shalt.err (!%p582_p0)
}
 0x47b   :  { %s586_s8 = scalar_lea.hbm %s764_s9, 128 }
 0x47c   :  { %p587_p1 = scmp.ne.s32.totalorder %s764_s9, %s586_s8  ;;  %p590_p2 = scmp.lt.u32.totalorder %s586_s8, %s764_s9 }
 0x47e   :  { %p592_p3 = pnand %p590_p2, %p587_p1 }
 0x480   :  { %595 = shalt.err (!%p592_p3)
}
 0x481   :  { %330 = dma.vmem_to_hbm [thread:$0]  %s328_s12, 128, %s764_s9, [#allocation4]  }
 0x482   :  { %600 = dma.done.wait [#allocation4], 128  }
 0x483   :  { %601 = vsyncadd [#allocation4], 4294967168 }
 0x484   :  { %334 = vsyncpa [#allocation3], 1 }
 0x485   :  { %335 = vsyncpa [#allocation6], 1 }
 0x486   :  { %336 = vsyncpa [#allocation4], 1 }

// kernel: tpu_custom_call.1
= control target key start
LH: loop header
LB: loop body
LE: loop exit
PB: predicated region body
PF: predicated region fallthrough
CT: control target
= control target key end

     0   :  { %14 = vsyncpa [#allocation3], 0  ;;  %s755_s0 = inlined_call_operand.hbm [shape: f32[8,128], index: 0, kind: input, shape index: {}]   ;;  %s756_s1 = inlined_call_operand.hbm [shape: f32[128,128], index: 1, kind: input, shape index: {}]   ;;  %s757_s2 = inlined_call_operand.vmem [shape: f32[1,128], index: 2, kind: input, shape index: {}]   ;;  %s758_s3 = inlined_call_operand.vmem [shape: f32[1,128], index: 3, kind: input, shape index: {}]   ;;  %s759_s4 = inlined_call_operand.vmem [shape: f32[1,128], index: 4, kind: input, shape index: {}]   ;;  %s760_s5 = inlined_call_operand.hbm [shape: f32[128,128], index: 5, kind: input, shape index: {}]   ;;  %s761_s6 = inlined_call_operand.vmem [shape: f32[1,128], index: 6, kind: input, shape index: {}]   ;;  %s762_s7 = inlined_call_operand.vmem [shape: f32[1,128], index: 7, kind: input, shape index: {}]   ;;  %s763_s8 = inlined_call_operand.vmem [shape: f32[1,128], index: 8, kind: input, shape index: {}]   ;;  %s764_s9 = inlined_call_operand.hbm [shape: f32[8,128], index: 9, kind: output, shape index: {}]  }
   0x1   :  { %15 = vsyncpa [#allocation6], 0 }
   0x2   :  { %16 = vsyncpa [#allocation4], 0  ;;  %s602_s30 = smov [#allocation5]   ;;  %s508_s13 = scalar_lea.hbm %s756_s1, 2048 }
   0x3   :  { %s32_s10 = sshll.u32 %s602_s30, 4  ;;  %p509_p0 = scmp.ne.s32.totalorder %s756_s1, %s508_s13  ;;  %s33_s10 = int_to_ptr.vmem [resolvable:$true] %s32_s10 }
   0x4   :  { %p512_p1 = scmp.lt.u32.totalorder %s508_s13, %s756_s1 }
   0x6   :  { %p514_p2 = pnand %p512_p1, %p509_p0 }
   0x8   :  { %517 = shalt.err (!%p514_p2)
}
   0x9   :  { %s518_s18 = scalar_lea.vmem %s33_s10, 2048  ;;  %p523_p4 = scmp.lt.s32.totalorder %s33_s10, %s33_s10 }
   0xa   :  { %p519_p3 = scmp.ne.s32.totalorder %s33_s10, %s518_s18  ;;  %p524_p5 = scmp.lt.s32.totalorder %s518_s18, %s518_s18 }
   0xc   :  { %p525_p6 = por %p524_p5, %p523_p4 }
   0xe   :  { %p526_p7 = pnand %p525_p6, %p519_p3 }
  0x10   :  { %529 = shalt.err (!%p526_p7)
}
  0x11   :  { %s603_s19 = smov 128   ;;  %s604_s20 = smov 8  }
  0x12   :  { %38 = dma.hbm_to_vmem [thread:$0]  %s756_s1, 2048, %s33_s10, [#allocation6], %s603_s19, %s603_s19, %s604_s20  }
  0x13   :  { %s605_s23 = smov [#allocation2]   ;;  %s606_s25 = smov [#allocation7]  }
  0x14   :  { %s23_s24 = sshll.u32 %s605_s23, 4  ;;  %s50_s26 = sshll.u32 %s606_s25, 4  ;;  %s24_s24 = int_to_ptr.vmem [resolvable:$true] %s23_s24  ;;  %s51_s26 = int_to_ptr.vmem [resolvable:$true] %s50_s26 }
  0x15   :  { %s530_s29 = scalar_lea.hbm %s755_s0, 128 }
  0x16   :  { %p531_p8 = scmp.ne.s32.totalorder %s755_s0, %s530_s29  ;;  %p534_p9 = scmp.lt.u32.totalorder %s530_s29, %s755_s0 }
  0x18   :  { %p536_p10 = pnand %p534_p9, %p531_p8 }
  0x1a   :  { %539 = shalt.err (!%p536_p10)
}
  0x1b   :  { %s540_s1 = scalar_lea.vmem %s24_s24, 128  ;;  %p545_p12 = scmp.lt.s32.totalorder %s24_s24, %s24_s24 }
  0x1c   :  { %p541_p11 = scmp.ne.s32.totalorder %s24_s24, %s540_s1  ;;  %p546_p13 = scmp.lt.s32.totalorder %s540_s1, %s540_s1 }
  0x1e   :  { %p547_p0 = por %p546_p13, %p545_p12 }
  0x20   :  { %p548_p1 = pnand %p547_p0, %p541_p11 }
  0x22   :  { %551 = shalt.err (!%p548_p1)
}
  0x23   :  { %26 = dma.hbm_to_vmem [thread:$0]  %s755_s0, 128, %s24_s24, [#allocation3]  }
  0x24   :  { %s552_s17 = scalar_lea.hbm %s760_s5, 2048 }
  0x25   :  { %p553_p2 = scmp.ne.s32.totalorder %s760_s5, %s552_s17  ;;  %p556_p3 = scmp.lt.u32.totalorder %s552_s17, %s760_s5 }
  0x27   :  { %p558_p4 = pnand %p556_p3, %p553_p2 }
  0x29   :  { %561 = shalt.err (!%p558_p4)
}
  0x2a   :  { %s562_s25 = scalar_lea.vmem %s51_s26, 2048  ;;  %p567_p6 = scmp.lt.s32.totalorder %s51_s26, %s51_s26 }
  0x2b   :  { %p563_p5 = scmp.ne.s32.totalorder %s51_s26, %s562_s25  ;;  %p568_p7 = scmp.lt.s32.totalorder %s562_s25, %s562_s25 }
  0x2d   :  { %p569_p8 = por %p568_p7, %p567_p6 }
  0x2f   :  { %p570_p9 = pnand %p569_p8, %p563_p5 }
  0x31   :  { %573 = shalt.err (!%p570_p9)
}
  0x32   :  { %56 = dma.hbm_to_vmem [thread:$0]  %s760_s5, 2048, %s51_s26, [#allocation6], %s603_s19, %s603_s19, %s604_s20  }
  0x33   :  { %596 = dma.done.wait [#allocation3], 128  }
  0x34   :  { %597 = vsyncadd [#allocation3], 4294967168 }
  0x35   :  { %598 = dma.done.wait [#allocation6], 4096  }
  0x36   :  { %599 = vsyncadd [#allocation6], 4294963200  ;;  %v607_v0 = vmov 0.0|0.0   ;;  %vm608_vm0 = vmmov 0   ;;  %v609_v1 = vmov 0.0   ;;  %v76_v2 = vld [vmem:[#allocation5] sm:$0xff]  ;;  %v72_v40 = vlaneseq }
  0x37   :  { %447 = vmatprep.subr.bf16.mxu0 %v607_v0  ;;  %409 = vmatprep.mubr.msk.f32.mxu0 %vm608_vm0, %v609_v1  ;;  %v77_v3 = vld [vmem:[#allocation5 + $0x8] sm:$0xff]  ;;  %v78_v4 = vld [vmem:[#allocation5 + $0x10] sm:$0xff]  ;;  %v79_v6 = vld [vmem:[#allocation5 + $0x18] sm:$0xff]  ;;  %s610_s11 = smov [#allocation8]  }
  0x38   :  { %471 = vmatprep.subr.bf16.mxu1 %v607_v0  ;;  %444 = vmatprep.mubr.msk.f32.mxu1 %vm608_vm0, %v609_v1  ;;  %v448_v5 = vpack.c.bf16 %v77_v3, %v76_v2  ;;  %v451_v7 = vpack.c.bf16 %v79_v6, %v78_v4  ;;  %v80_v8 = vld [vmem:[#allocation5 + $0x20] sm:$0xff]  ;;  %v81_v9 = vld [vmem:[#allocation5 + $0x28] sm:$0xff]  ;;  %v82_v11 = vld [vmem:[#allocation5 + $0x30] sm:$0xff]  ;;  %v73_v41 = vand.u32 127, %v72_v40  ;;  %s327_s12 = sshll.u32 %s610_s11, 4  ;;  %s328_s12 = int_to_ptr.vmem [resolvable:$true] %s327_s12 }
  0x39   :  { %v454_v10 = vpack.c.bf16 %v81_v9, %v80_v8  ;;  %v83_v12 = vld [vmem:[#allocation5 + $0x38] sm:$0xff]  ;;  %v84_v14 = vld [vmem:[#allocation5 + $0x40] sm:$0xff]  ;;  %v85_v15 = vld [vmem:[#allocation5 + $0x48] sm:$0xff]  ;;  %s574_s13 = scalar_lea.vmem %s328_s12, 128  ;;  %p579_p11 = scmp.lt.s32.totalorder %s328_s12, %s328_s12 }
  0x3a   :  { %449 = vmatpush3.bf16.msra.mxu0 %v448_v5  ;;  %v457_v13 = vpack.c.bf16 %v83_v12, %v82_v11  ;;  %v460_v16 = vpack.c.bf16 %v85_v15, %v84_v14  ;;  %v86_v17 = vld [vmem:[#allocation5 + $0x50] sm:$0xff]  ;;  %v87_v18 = vld [vmem:[#allocation5 + $0x58] sm:$0xff]  ;;  %v88_v20 = vld [vmem:[#allocation5 + $0x60] sm:$0xff]  ;;  %vm74_vm1 = vcmp.lt.s32.totalorder %v73_v41, 32  ;;  %p575_p10 = scmp.ne.s32.totalorder %s328_s12, %s574_s13  ;;  %p580_p12 = scmp.lt.s32.totalorder %s574_s13, %s574_s13 }
  0x3b   :  { %450 = vmatprep.subr.bf16.mxu0 %v607_v0  ;;  %v463_v19 = vpack.c.bf16 %v87_v18, %v86_v17  ;;  %v89_v21 = vld [vmem:[#allocation5 + $0x68] sm:$0xff]  ;;  %v90_v23 = vld [vmem:[#allocation5 + $0x70] sm:$0xff]  ;;  %v91_v24 = vld [vmem:[#allocation5 + $0x78] sm:$0xff] }
  0x3c   :  { %v466_v22 = vpack.c.bf16 %v89_v21, %v88_v20  ;;  %v469_v25 = vpack.c.bf16 %v91_v24, %v90_v23  ;;  %v712_v26 = vld [vmem:[#allocation2] sm:$0xff]  ;;  %v197_v31 = vld [vmem:[#allocation7] sm:$0xff]  ;;  %v198_v32 = vld [vmem:[#allocation7 + $0x8] sm:$0xff]  ;;  %p581_p13 = por %p580_p12, %p579_p11 }
  0x3d   :  { %v337_v27 = vld [vmem:[%s757_s2] ss:$0 sm:$0xff]  ;;  %v199_v33 = vld [vmem:[#allocation7 + $0x10] sm:$0xff]  ;;  %v472_v34 = vpack.c.bf16 %v198_v32, %v197_v31  ;;  %v201_v37 = vld [vmem:[#allocation7 + $0x20] sm:$0xff] }
  0x3e   :  { %452 = vmatpush3.bf16.msra.mxu0 %v451_v7  ;;  %v200_v35 = vld [vmem:[#allocation7 + $0x18] sm:$0xff]  ;;  %v202_v38 = vld [vmem:[#allocation7 + $0x28] sm:$0xff]  ;;  %v203_v47 = vld [vmem:[#allocation7 + $0x30] sm:$0xff]  ;;  %p582_p0 = pnand %p581_p13, %p575_p10 }
  0x3f   :  { %453 = vmatprep.subr.bf16.mxu0 %v607_v0  ;;  %473 = vmatpush3.bf16.msra.mxu1 %v472_v34  ;;  %v475_v36 = vpack.c.bf16 %v200_v35, %v199_v33  ;;  %v478_v39 = vpack.c.bf16 %v202_v38, %v201_v37  ;;  %v204_v48 = vld [vmem:[#allocation7 + $0x38] sm:$0xff]  ;;  %v205_v50 = vld [vmem:[#allocation7 + $0x40] sm:$0xff]  ;;  %v206_v51 = vld [vmem:[#allocation7 + $0x48] sm:$0xff] }
  0x40   :  { %474 = vmatprep.subr.bf16.mxu1 %v607_v0  ;;  %v481_v49 = vpack.c.bf16 %v204_v48, %v203_v47  ;;  %v484_v52 = vpack.c.bf16 %v206_v51, %v205_v50  ;;  %v207_v53 = vld [vmem:[#allocation7 + $0x50] sm:$0xff]  ;;  %v208_v54 = vld [vmem:[#allocation7 + $0x58] sm:$0xff]  ;;  %v209_v56 = vld [vmem:[#allocation7 + $0x60] sm:$0xff] }
  0x41   :  { %v487_v55 = vpack.c.bf16 %v208_v54, %v207_v53  ;;  %v210_v57 = vld [vmem:[#allocation7 + $0x68] sm:$0xff]  ;;  %v211_v59 = vld [vmem:[#allocation7 + $0x70] sm:$0xff]  ;;  %v212_v60 = vld [vmem:[#allocation7 + $0x78] sm:$0xff] }
  0x42   :  { %455 = vmatpush3.bf16.msra.mxu0 %v454_v10  ;;  %v490_v58 = vpack.c.bf16 %v210_v57, %v209_v56  ;;  %v493_v61 = vpack.c.bf16 %v212_v60, %v211_v59  ;;  %v338_v3 = vld [vmem:[%s758_s3] ss:$0 sm:$0xff] }
  0x43   :  { %456 = vmatprep.subr.bf16.mxu0 %v607_v0  ;;  %476 = vmatpush3.bf16.msra.mxu1 %v475_v36  ;;  %v339_v5 = vld [vmem:[%s759_s4] ss:$0 sm:$0xff] }
  0x44   :  { %477 = vmatprep.subr.bf16.mxu1 %v607_v0  ;;  %v341_v20 = vld [vmem:[%s762_s7] ss:$0 sm:$0xff] }
  0x46   :  { %458 = vmatpush3.bf16.msra.mxu0 %v457_v13 }
  0x47   :  { %459 = vmatprep.subr.bf16.mxu0 %v607_v0  ;;  %479 = vmatpush3.bf16.msra.mxu1 %v478_v39 }
  0x48   :  { %480 = vmatprep.subr.bf16.mxu1 %v607_v0 }
  0x4a   :  { %461 = vmatpush3.bf16.msra.mxu0 %v460_v16 }
  0x4b   :  { %462 = vmatprep.subr.bf16.mxu0 %v607_v0  ;;  %482 = vmatpush3.bf16.msra.mxu1 %v481_v49 }
  0x4c   :  { %483 = vmatprep.subr.bf16.mxu1 %v607_v0 }
  0x4e   :  { %464 = vmatpush3.bf16.msra.mxu0 %v463_v19 }
  0x4f   :  { %465 = vmatprep.subr.bf16.mxu0 %v607_v0  ;;  %485 = vmatpush3.bf16.msra.mxu1 %v484_v52 }
  0x50   :  { %486 = vmatprep.subr.bf16.mxu1 %v607_v0 }
  0x52   :  { %467 = vmatpush3.bf16.msra.mxu0 %v466_v22  ;;  %v342_v22 = vld [vmem:[%s763_s8] ss:$0 sm:$0xff] }
  0x53   :  { %468 = vmatprep.subr.bf16.mxu0 %v607_v0  ;;  %488 = vmatpush3.bf16.msra.mxu1 %v487_v55 }
  0x54   :  { %489 = vmatprep.subr.bf16.mxu1 %v607_v0 }
  0x56   :  { %470 = vmatpush3.bf16.msra.mxu0 %v469_v25 }
  0x57   :  { %491 = vmatpush3.bf16.msra.mxu1 %v490_v58 }
  0x58   :  { %492 = vmatprep.subr.bf16.mxu1 %v607_v0  ;;  %v340_v0 = vld [vmem:[%s761_s6] ss:$0 sm:$0xff] }
  0x59   :  { %410 = vmatmul.mubr.f32.vlgmr.msra.gmra.mrb[0].mxu0 %v712_v26 }
  0x5b   :  { %494 = vmatpush3.bf16.msra.mxu1 %v493_v61 }
 0x12c   :  { %v165_v28 = vpop.f32.mrb[0].mxu0 }
 0x12d   :  { %v166_v29 = vadd.f32 %v337_v27, %v165_v28  ;;  %v411_v30 = vpop.f32.mrb[1].mxu0 }
 0x12f   :  { %171 = vadd.xlane.f32.xlu0 %v166_v29 }
 0x1bc   :  { %v172_v42 = vpop.xlane.xlu0 %171 }
 0x1bd   :  { %v173_v43 = vmul.f32 0.03125, %v172_v42 }
 0x1bf   :  { %v174_v44 = vsub.f32 %v166_v29, %v173_v43 }
 0x1c1   :  { %v175_v45 = vsel %vm74_vm1, %v174_v44, 0.0 }
 0x1c2   :  { %v176_v46 = vmul.f32 %v175_v45, %v175_v45 }
 0x1c4   :  { %177 = vadd.xlane.f32.xlu0 %v176_v46 }
 0x251   :  { %v178_v62 = vpop.xlane.xlu0 %177 }
 0x252   :  { %v179_v63 = vmul.f32 0.03125, %v178_v62 }
 0x254   :  { %v180_v1 = vadd.f32 1e-05, %v179_v63 }
 0x256   :  { %504 = vrsqrt.f32 %v180_v1 }
 0x260   :  { %v505_v2 = vpop.eup %504 }
 0x261   :  { %v182_v4 = vmul.f32 %v505_v2, %v175_v45 }
 0x263   :  { %v189_v6 = vmul.f32 %v338_v3, %v182_v4 }
 0x265   :  { %v196_v7 = vadd.f32 %v339_v5, %v189_v6 }
 0x267   :  { %445 = vmatmul.mubr.f32.vlgmr.msra.gmra.mrb[0].mxu1 %v196_v7 }
 0x33a   :  { %v286_v8 = vpop.f32.mrb[0].mxu1 }
 0x33b   :  { %v287_v9 = vadd.f32 %v340_v0, %v286_v8  ;;  %v446_v10 = vpop.f32.mrb[1].mxu1 }
 0x33d   :  { %292 = vadd.xlane.f32.xlu1 %v287_v9 }
 0x3ca   :  { %v293_v11 = vpop.xlane.xlu1 %292 }
 0x3cb   :  { %v294_v12 = vmul.f32 0.03125, %v293_v11 }
 0x3cd   :  { %v295_v13 = vsub.f32 %v287_v9, %v294_v12 }
 0x3cf   :  { %v296_v14 = vsel %vm74_vm1, %v295_v13, 0.0 }
 0x3d0   :  { %v297_v15 = vmul.f32 %v296_v14, %v296_v14 }
 0x3d2   :  { %298 = vadd.xlane.f32.xlu1 %v297_v15 }
 0x45f   :  { %v299_v16 = vpop.xlane.xlu1 %298 }
 0x460   :  { %v300_v17 = vmul.f32 0.03125, %v299_v16 }
 0x462   :  { %v301_v18 = vadd.f32 1e-05, %v300_v17 }
 0x464   :  { %506 = vrsqrt.f32 %v301_v18 }
 0x46e   :  { %v507_v19 = vpop.eup %506 }
 0x46f   :  { %v303_v21 = vmul.f32 %v507_v19, %v296_v14 }
 0x471   :  { %v310_v23 = vmul.f32 %v341_v20, %v303_v21 }
 0x473   :  { %v317_v24 = vadd.f32 %v342_v22, %v310_v23 }
 0x475   :  { %v318_v25 = vmax.f32 %v317_v24, 0.0 }
 0x477   :  { %v319_v27 = vadd.f32 %v318_v25, %v712_v26 }
 0x479   :  { %320 = vst [vmem:[#allocation8] sm:$0xff] %v319_v27 }
 0x47a   :  { %585 = shalt.err (!%p582_p0)
}
 0x47b   :  { %s586_s8 = scalar_lea.hbm %s764_s9, 128 }
 0x47c   :  { %p587_p1 = scmp.ne.s32.totalorder %s764_s9, %s586_s8  ;;  %p590_p2 = scmp.lt.u32.totalorder %s586_s8, %s764_s9 }
 0x47e   :  { %p592_p3 = pnand %p590_p2, %p587_p1 }
 0x480   :  { %595 = shalt.err (!%p592_p3)
}
 0x481   :  { %330 = dma.vmem_to_hbm [thread:$0]  %s328_s12, 128, %s764_s9, [#allocation4]  }
 0x482   :  { %600 = dma.done.wait [#allocation4], 128  }
 0x483   :  { %601 = vsyncadd [#allocation4], 4294967168 }
 0x484   :  { %334 = vsyncpa [#allocation3], 1 }
 0x485   :  { %335 = vsyncpa [#allocation6], 1 }
 0x486   :  { %336 = vsyncpa [#allocation4], 1 }

</bundles_post_ra>
